<compile_context>
chip_gen: v7x
topology: tpu7x:2x2x1
jax: 0.10.0
libtpu: 0.0.40
codegen_flags: <defaults>
</compile_context>

<pallas_src>
import functools
import math

import jax
import jax.numpy as jnp
from jax.experimental import pallas as pl
from jax.experimental.pallas import tpu as pltpu


# ---------------------------------------------------------------------------
# Kernel
# ---------------------------------------------------------------------------
def _bahdanau_kernel(*refs, has_mask):
    """Fused Bahdanau attention for a tile of Bt batch rows.

    refs (has_mask=True):
      enc_ref  : (Bt, S, E)  encoder states
      dec_ref  : (Bt, 1, D)  decoder state
      mask_ref : (Bt, 1, S)  int8 mask (0 => masked out)
      wenc_ref : (A, E)      encoder_projection.weight   (torch [out, in] layout)
      wdec_ref : (A, D)      decoder_projection.weight
      watt_ref : (1, A)      attention_weight.weight
      ctx_ref  : (Bt, 1, E)  context output
      attn_ref : (Bt, 1, S)  attention-weights output
    """
    if has_mask:
        (enc_ref, dec_ref, mask_ref,
         wenc_ref, wdec_ref, watt_ref, ctx_ref, attn_ref) = refs
    else:
        (enc_ref, dec_ref,
         wenc_ref, wdec_ref, watt_ref, ctx_ref, attn_ref) = refs
        mask_ref = None

    Bt, S, E = enc_ref.shape
    A = watt_ref.shape[1]

    enc = enc_ref[...]                                   # (Bt, S, E)
    dec = dec_ref[...].reshape(Bt, -1)                   # (Bt, D)

    # Encoder projection: (Bt*S, E) x (A, E)^T  -- native trans-B MXU form,
    # full-height M = Bt*S rows, f32 accumulation.
    pe = jax.lax.dot_general(
        enc.reshape(Bt * S, E), wenc_ref[...],
        dimension_numbers=(((1,), (1,)), ((), ())),
        preferred_element_type=jnp.float32)              # (Bt*S, A)

    # Decoder projection: (Bt, D) x (A, D)^T.
    pd = jax.lax.dot_general(
        dec, wdec_ref[...],
        dimension_numbers=(((1,), (1,)), ((), ())),
        preferred_element_type=jnp.float32)              # (Bt, A)

    # Additive energies; tanh runs on the EUP slot.
    t = jnp.tanh(pe.reshape(Bt, S, A) + pd[:, None, :])  # (Bt, S, A) f32

    # scores[b, s] = sum_a v[a] * t[b, s, a] -> (Bt, S), S kept in the lane dim.
    # (VPU multiply + XLU lane reduce; MXU occupancy is irrelevant here.)
    v = watt_ref[...].astype(jnp.float32)                # (1, A)
    scores = jnp.sum(t * v[None, :, :], axis=-1)         # (Bt, S)

    if has_mask:
        keep = mask_ref[...][:, 0, :] != 0               # (Bt, S) bool
        scores = jnp.where(keep, scores, jnp.float32(-1e9))

    # Numerically stable softmax along the lane (S) dim.
    m = jnp.max(scores, axis=-1, keepdims=True)
    e = jnp.exp(scores - m)
    denom = jnp.sum(e, axis=-1, keepdims=True)
    w = (e * pl.reciprocal(denom))[:, None, :]           # (Bt, 1, S) f32

    # Context: batched (1, S) @ (S, E) per row, f32 accumulation on the MXU.
    ctx = jnp.einsum('bqs,bse->bqe', w, enc,
                     preferred_element_type=jnp.float32)  # (Bt, 1, E)

    attn_ref[...] = w.astype(attn_ref.dtype)
    ctx_ref[...] = ctx.astype(ctx_ref.dtype)


# ---------------------------------------------------------------------------
# Batch-tile selection
# ---------------------------------------------------------------------------
def _pick_batch_tile(B, S, E, A, enc_itemsize, vmem_budget_bytes=24 * 1024 * 1024):
    """Largest divisor of B that keeps one grid step's VMEM footprint under budget
    while leaving >= ~4 grid steps for pipelining / megacore sharding."""
    per_row = (2 * S * E * enc_itemsize        # double-buffered encoder block
               + 2 * S * A * 4                 # pe / tanh energies (f32)
               + 2 * (E + S) * 4)              # output blocks (double-buffered)
    bt = max(1, vmem_budget_bytes // max(per_row, 1))
    bt = min(bt, max(1, B // 4), B)            # keep several grid steps alive
    bt = int(bt)
    while B % bt:
        bt -= 1
    return bt


# ---------------------------------------------------------------------------
# Wrapper
# ---------------------------------------------------------------------------
def bahdanau_attention(encoder_states, decoder_state, params, encoder_mask=None,
                       batch_tile=None):
    """Runs the fused Pallas kernel. Returns (context [B,E], attention_weights [B,S])."""
    B, S, E = encoder_states.shape
    D = decoder_state.shape[-1]
    A = params["w_att"].shape[-1]              # attention_size (torch weight is [1, A])

    if batch_tile is None:
        batch_tile = _pick_batch_tile(B, S, E, A, encoder_states.dtype.itemsize)
    Bt = int(batch_tile)
    assert B % Bt == 0, "batch_tile must divide the batch size"

    # Keep tiled batch rows OUT of the last-two dims (those stay full-extent),
    # so the (8,128) block-shape constraint never triggers on small Bt.
    dec3 = decoder_state.reshape(B, 1, D)

    has_mask = encoder_mask is not None
    args = [encoder_states, dec3]
    data_specs = [
        pl.BlockSpec((Bt, S, E), lambda b: (b, 0, 0)),   # encoder states
        pl.BlockSpec((Bt, 1, D), lambda b: (b, 0, 0)),   # decoder state
    ]
    if has_mask:
        mask3 = (encoder_mask != 0).astype(jnp.int8).reshape(B, 1, S)
        args.append(mask3)
        data_specs.append(pl.BlockSpec((Bt, 1, S), lambda b: (b, 0, 0)))
    # Weights go last, in the original torch [out, in] layout (no wrapper .T).
    args += [params["w_enc"], params["w_dec"], params["w_att"]]

    kernel = functools.partial(_bahdanau_kernel, has_mask=has_mask)
    out_shape = (
        jax.ShapeDtypeStruct((B, 1, E), encoder_states.dtype),
        jax.ShapeDtypeStruct((B, 1, S), jnp.float32),
    )
    out_specs = [
        pl.BlockSpec((Bt, 1, E), lambda b: (b, 0, 0)),   # context
        pl.BlockSpec((Bt, 1, S), lambda b: (b, 0, 0)),   # attention weights
    ]
    compiler_params = pltpu.CompilerParams(
        dimension_semantics=("parallel",),
        # 48 MiB: headroom on v7x (64 MiB physical per TC); still a raise over
        # the 16/32 MiB scoped defaults on v5e/v6e (which can go higher).
        vmem_limit_bytes=48 * 1024 * 1024)

    def run(single_buffer_weights):
        if single_buffer_weights:
            # Constant-index resident weights only need one buffer.
            w_specs = [
                pl.BlockSpec((A, E), lambda b: (0, 0), pipeline_mode=pl.Buffered(1)),
                pl.BlockSpec((A, D), lambda b: (0, 0), pipeline_mode=pl.Buffered(1)),
                pl.BlockSpec((1, A), lambda b: (0, 0), pipeline_mode=pl.Buffered(1)),
            ]
        else:
            w_specs = [
                pl.BlockSpec((A, E), lambda b: (0, 0)),
                pl.BlockSpec((A, D), lambda b: (0, 0)),
                pl.BlockSpec((1, A), lambda b: (0, 0)),
            ]
        return pl.pallas_call(
            kernel,
            out_shape=out_shape,
            grid_spec=pltpu.PrefetchScalarGridSpec(
                num_scalar_prefetch=0,
                grid=(B // Bt,),
                in_specs=data_specs + w_specs,
                out_specs=out_specs),
            compiler_params=compiler_params,
        )(*args)

    try:
        ctx, attn = run(True)
    except Exception:
        # TODO(synk): drop this fallback once pl.Buffered(1) single-buffered
        # resident weights are supported by the installed jax/libtpu.
        ctx, attn = run(False)

    return ctx.reshape(B, E), attn.reshape(B, S)


# ---------------------------------------------------------------------------
# Parameter init (mirrors the PyTorch module's __init__)
# ---------------------------------------------------------------------------
def _xavier_uniform(key, fan_out, fan_in, dtype=jnp.float32):
    bound = math.sqrt(6.0 / (fan_in + fan_out))
    return jax.random.uniform(key, (fan_out, fan_in), dtype, minval=-bound, maxval=bound)


def init_params(key, encoder_hidden_size, decoder_hidden_size, attention_size):
    """torch Linear weights are [out_features, in_features], xavier_uniform_, no bias."""
    k1, k2, k3 = jax.random.split(key, 3)
    return {
        "w_enc": _xavier_uniform(k1, attention_size, encoder_hidden_size),  # (A, E)
        "w_dec": _xavier_uniform(k2, attention_size, decoder_hidden_size),  # (A, D)
        "w_att": _xavier_uniform(k3, 1, attention_size),                    # (1, A)
    }


# ---------------------------------------------------------------------------
# Pure-JAX reference (mirrors the PyTorch forward)
# ---------------------------------------------------------------------------
def _reference(encoder_states, decoder_state, params, encoder_mask=None):
    pe = encoder_states @ params["w_enc"].T                       # (B, S, A)
    pd = (decoder_state @ params["w_dec"].T)[:, None, :]          # (B, 1, A)
    t = jnp.tanh(pe + pd)
    scores = (t @ params["w_att"].T)[..., 0]                      # (B, S)
    if encoder_mask is not None:
        scores = jnp.where(encoder_mask == 0, jnp.float32(-1e9), scores)
    w = jax.nn.softmax(scores, axis=-1)
    ctx = jnp.sum(w[..., None] * encoder_states, axis=1)
    return ctx, w


# ---------------------------------------------------------------------------
# Self-test
# ---------------------------------------------------------------------------
if __name__ == "__main__":
    B, S = 8, 8
    encoder_hidden, decoder_hidden, attention_size = 32, 32, 64

    root = jax.random.PRNGKey(0)
    kp, ke, kd = jax.random.split(root, 3)
    params = init_params(kp, encoder_hidden, decoder_hidden, attention_size)

    encoder_states = jax.random.normal(ke, (B, S, encoder_hidden), jnp.float32)
    decoder_state = jax.random.normal(kd, (B, decoder_hidden), jnp.float32)

    # ---- no-mask path (mask-free kernel variant: no dummy mask DMA) ----
    ctx, attn = bahdanau_attention(encoder_states, decoder_state, params)
    ctx = jax.block_until_ready(ctx)
    attn = jax.block_until_ready(attn)

    ref_ctx, ref_attn = _reference(encoder_states, decoder_state, params)
    assert ctx.shape == (B, encoder_hidden) and attn.shape == (B, S)
    assert jnp.allclose(ctx, ref_ctx, atol=1e-4, rtol=1e-4), "context mismatch (no mask)"
    assert jnp.allclose(attn, ref_attn, atol=1e-4, rtol=1e-4), "weights mismatch (no mask)"
    assert jnp.allclose(jnp.sum(attn, axis=-1), 1.0, atol=1e-5)

    # ---- masked path (variable lengths; every row keeps >= 1 position) ----
    lengths = jnp.array([S, 5, 3, S, 1, 7, 6, 2], jnp.int32)
    mask = (jnp.arange(S)[None, :] < lengths[:, None]).astype(jnp.float32)   # (B, S)

    ctx_m, attn_m = bahdanau_attention(encoder_states, decoder_state, params,
                                       encoder_mask=mask)
    ctx_m = jax.block_until_ready(ctx_m)
    attn_m = jax.block_until_ready(attn_m)

    ref_ctx_m, ref_attn_m = _reference(encoder_states, decoder_state, params,
                                       encoder_mask=mask)
    assert jnp.allclose(ctx_m, ref_ctx_m, atol=1e-4, rtol=1e-4), "context mismatch (mask)"
    assert jnp.allclose(attn_m, ref_attn_m, atol=1e-4, rtol=1e-4), "weights mismatch (mask)"
    # masked positions must carry ~zero weight
    assert jnp.all(jnp.where(mask == 0, attn_m, 0.0) < 1e-6)

    print("KERNEL_OK")
</pallas_src>

<mosaic_0001>
module attributes {stable_mosaic.version = 11 : i64} {
  func.func @_bahdanau_kernel(%arg0: i32, %arg1: memref<2x8x32xf32, #tpu.memory_space<vmem>>, %arg2: memref<2x1x32xf32, #tpu.memory_space<vmem>>, %arg3: memref<64x32xf32, #tpu.memory_space<vmem>>, %arg4: memref<64x32xf32, #tpu.memory_space<vmem>>, %arg5: memref<1x64xf32, #tpu.memory_space<vmem>>, %arg6: memref<2x1x32xf32, #tpu.memory_space<vmem>>, %arg7: memref<2x1x8xf32, #tpu.memory_space<vmem>>) attributes {dimension_semantics = [#tpu.dimension_semantics<parallel>], iteration_bounds = array<i64: 4>, scalar_prefetch = 0 : i64, scratch_operands = 0 : i64, tpu.core_type = #tpu.core_type<tc>, window_params = [{transform_indices = @transform_0, window_bounds = array<i64: 2, 8, 32>}, {transform_indices = @transform_1, window_bounds = array<i64: 2, 1, 32>}, {pipeline_mode = #tpu.pipeline_mode<synchronous>, transform_indices = @transform_2, window_bounds = array<i64: 64, 32>}, {pipeline_mode = #tpu.pipeline_mode<synchronous>, transform_indices = @transform_3, window_bounds = array<i64: 64, 32>}, {pipeline_mode = #tpu.pipeline_mode<synchronous>, transform_indices = @transform_4, window_bounds = array<i64: 1, 64>}, {transform_indices = @transform_5, window_bounds = array<i64: 2, 1, 32>}, {transform_indices = @transform_6, window_bounds = array<i64: 2, 1, 8>}]} {
    %c0 = arith.constant 0 : index
    %c0_0 = arith.constant 0 : index
    %c0_1 = arith.constant 0 : index
    %0 = vector.load %arg1[%c0, %c0_0, %c0_1] : memref<2x8x32xf32, #tpu.memory_space<vmem>>, vector<2x8x32xf32>
    %c0_2 = arith.constant 0 : index
    %c0_3 = arith.constant 0 : index
    %c0_4 = arith.constant 0 : index
    %1 = vector.load %arg2[%c0_2, %c0_3, %c0_4] : memref<2x1x32xf32, #tpu.memory_space<vmem>>, vector<2x1x32xf32>
    %2 = vector.shape_cast %1 : vector<2x1x32xf32> to vector<2x32xf32>
    %3 = vector.shape_cast %0 : vector<2x8x32xf32> to vector<16x32xf32>
    %c0_5 = arith.constant 0 : index
    %c0_6 = arith.constant 0 : index
    %4 = vector.load %arg3[%c0_5, %c0_6] : memref<64x32xf32, #tpu.memory_space<vmem>>, vector<64x32xf32>
    %cst = arith.constant dense<0.000000e+00> : vector<16x64xf32>
    %5 = tpu.matmul %3, %4, %cst {dimension_numbers = #tpu.dot_dimension_numbers<[1], [1], [0], [0], [0, 0, 1, 0], [], []>} : vector<16x32xf32>, vector<64x32xf32>, vector<16x64xf32> -> vector<16x64xf32>
    %c0_7 = arith.constant 0 : index
    %c0_8 = arith.constant 0 : index
    %6 = vector.load %arg4[%c0_7, %c0_8] : memref<64x32xf32, #tpu.memory_space<vmem>>, vector<64x32xf32>
    %cst_9 = arith.constant dense<0.000000e+00> : vector<2x64xf32>
    %7 = tpu.matmul %2, %6, %cst_9 {dimension_numbers = #tpu.dot_dimension_numbers<[1], [1], [0], [0], [0, 0, 1, 0], [], []>} : vector<2x32xf32>, vector<64x32xf32>, vector<2x64xf32> -> vector<2x64xf32>
    %8 = vector.shape_cast %5 : vector<16x64xf32> to vector<2x8x64xf32>
    %9 = vector.shape_cast %7 : vector<2x64xf32> to vector<2x1x64xf32>
    %10 = vector.broadcast %9 : vector<2x1x64xf32> to vector<2x8x64xf32>
    %11 = arith.addf %8, %10 : vector<2x8x64xf32>
    %12 = math.tanh %11 : vector<2x8x64xf32>
    %c0_10 = arith.constant 0 : index
    %c0_11 = arith.constant 0 : index
    %13 = vector.load %arg5[%c0_10, %c0_11] : memref<1x64xf32, #tpu.memory_space<vmem>>, vector<1x64xf32>
    %14 = vector.shape_cast %13 : vector<1x64xf32> to vector<1x1x64xf32>
    %15 = vector.broadcast %14 : vector<1x1x64xf32> to vector<2x8x64xf32>
    %16 = arith.mulf %12, %15 : vector<2x8x64xf32>
    %cst_12 = arith.constant dense<0.000000e+00> : vector<2x8xf32>
    %17 = vector.multi_reduction <add>, %16, %cst_12 [2] : vector<2x8x64xf32> to vector<2x8xf32>
    %cst_13 = arith.constant dense<0xFF800000> : vector<2xf32>
    %18 = vector.multi_reduction <maximumf>, %17, %cst_13 [1] : vector<2x8xf32> to vector<2xf32>
    %19 = vector.shape_cast %18 : vector<2xf32> to vector<2x1xf32>
    %20 = vector.broadcast %19 : vector<2x1xf32> to vector<2x8xf32>
    %21 = arith.subf %17, %20 : vector<2x8xf32>
    %22 = math.exp %21 : vector<2x8xf32>
    %cst_14 = arith.constant dense<0.000000e+00> : vector<2xf32>
    %23 = vector.multi_reduction <add>, %22, %cst_14 [1] : vector<2x8xf32> to vector<2xf32>
    %24 = vector.shape_cast %23 : vector<2xf32> to vector<2x1xf32>
    %25 = tpu.reciprocal %24 : vector<2x1xf32> -> vector<2x1xf32>
    %26 = vector.broadcast %25 : vector<2x1xf32> to vector<2x8xf32>
    %27 = arith.mulf %22, %26 : vector<2x8xf32>
    %28 = vector.shape_cast %27 : vector<2x8xf32> to vector<2x1x8xf32>
    "tpu.trace_start"() <{level = 10 : i32, message = "bqs,bse->bqe"}> : () -> ()
    %cst_15 = arith.constant dense<0.000000e+00> : vector<2x1x32xf32>
    %29 = tpu.matmul %28, %0, %cst_15 {dimension_numbers = #tpu.dot_dimension_numbers<[2], [1], [1], [2], [0, 0, 0, 1, 1, 2], [0], [0]>} : vector<2x1x8xf32>, vector<2x8x32xf32>, vector<2x1x32xf32> -> vector<2x1x32xf32>
    "tpu.trace_stop"() : () -> ()
    %c0_16 = arith.constant 0 : index
    %c0_17 = arith.constant 0 : index
    %c0_18 = arith.constant 0 : index
    %30 = vector.load %arg7[%c0_16, %c0_17, %c0_18] : memref<2x1x8xf32, #tpu.memory_space<vmem>>, vector<2x1x8xf32>
    tpu.vector_store %arg7[%c0_16, %c0_17, %c0_18], %28 {strides = array<i32>} : memref<2x1x8xf32, #tpu.memory_space<vmem>>, vector<2x1x8xf32>,
    %c0_19 = arith.constant 0 : index
    %c0_20 = arith.constant 0 : index
    %c0_21 = arith.constant 0 : index
    %31 = vector.load %arg6[%c0_19, %c0_20, %c0_21] : memref<2x1x32xf32, #tpu.memory_space<vmem>>, vector<2x1x32xf32>
    tpu.vector_store %arg6[%c0_19, %c0_20, %c0_21], %29 {strides = array<i32>} : memref<2x1x32xf32, #tpu.memory_space<vmem>>, vector<2x1x32xf32>,
    return
  }
  func.func @transform_0(%arg0: i32) -> (i32, i32, i32) {
    %c0_i32 = arith.constant 0 : i32
    %c0_i32_0 = arith.constant 0 : i32
    %c0_i32_1 = arith.constant 0 : i32
    return %arg0, %c0_i32, %c0_i32_0 : i32, i32, i32
  }
  func.func @transform_1(%arg0: i32) -> (i32, i32, i32) {
    %c0_i32 = arith.constant 0 : i32
    %c0_i32_0 = arith.constant 0 : i32
    %c0_i32_1 = arith.constant 0 : i32
    return %arg0, %c0_i32, %c0_i32_0 : i32, i32, i32
  }
  func.func @transform_2(%arg0: i32) -> (i32, i32) {
    %c0_i32 = arith.constant 0 : i32
    %c0_i32_0 = arith.constant 0 : i32
    %c0_i32_1 = arith.constant 0 : i32
    return %c0_i32, %c0_i32_0 : i32, i32
  }
  func.func @transform_3(%arg0: i32) -> (i32, i32) {
    %c0_i32 = arith.constant 0 : i32
    %c0_i32_0 = arith.constant 0 : i32
    %c0_i32_1 = arith.constant 0 : i32
    return %c0_i32, %c0_i32_0 : i32, i32
  }
  func.func @transform_4(%arg0: i32) -> (i32, i32) {
    %c0_i32 = arith.constant 0 : i32
    %c0_i32_0 = arith.constant 0 : i32
    %c0_i32_1 = arith.constant 0 : i32
    return %c0_i32, %c0_i32_0 : i32, i32
  }
  func.func @transform_5(%arg0: i32) -> (i32, i32, i32) {
    %c0_i32 = arith.constant 0 : i32
    %c0_i32_0 = arith.constant 0 : i32
    %c0_i32_1 = arith.constant 0 : i32
    return %arg0, %c0_i32, %c0_i32_0 : i32, i32, i32
  }
  func.func @transform_6(%arg0: i32) -> (i32, i32, i32) {
    %c0_i32 = arith.constant 0 : i32
    %c0_i32_0 = arith.constant 0 : i32
    %c0_i32_1 = arith.constant 0 : i32
    return %arg0, %c0_i32, %c0_i32_0 : i32, i32, i32
  }
}

module attributes {stable_mosaic.version = 11 : i64} {
  func.func @_bahdanau_kernel(%arg0: i32, %arg1: memref<2x8x32xf32, #tpu.memory_space<vmem>>, %arg2: memref<2x1x32xf32, #tpu.memory_space<vmem>>, %arg3: memref<64x32xf32, #tpu.memory_space<vmem>>, %arg4: memref<64x32xf32, #tpu.memory_space<vmem>>, %arg5: memref<1x64xf32, #tpu.memory_space<vmem>>, %arg6: memref<2x1x32xf32, #tpu.memory_space<vmem>>, %arg7: memref<2x1x8xf32, #tpu.memory_space<vmem>>) attributes {dimension_semantics = [#tpu.dimension_semantics<parallel>], iteration_bounds = array<i64: 4>, scalar_prefetch = 0 : i64, scratch_operands = 0 : i64, tpu.core_type = #tpu.core_type<tc>, window_params = [{transform_indices = @transform_0, window_bounds = array<i64: 2, 8, 32>}, {transform_indices = @transform_1, window_bounds = array<i64: 2, 1, 32>}, {pipeline_mode = #tpu.pipeline_mode<synchronous>, transform_indices = @transform_2, window_bounds = array<i64: 64, 32>}, {pipeline_mode = #tpu.pipeline_mode<synchronous>, transform_indices = @transform_3, window_bounds = array<i64: 64, 32>}, {pipeline_mode = #tpu.pipeline_mode<synchronous>, transform_indices = @transform_4, window_bounds = array<i64: 1, 64>}, {transform_indices = @transform_5, window_bounds = array<i64: 2, 1, 32>}, {transform_indices = @transform_6, window_bounds = array<i64: 2, 1, 8>}]} {
    %c0 = arith.constant 0 : index
    %c0_0 = arith.constant 0 : index
    %c0_1 = arith.constant 0 : index
    %0 = vector.load %arg1[%c0, %c0_0, %c0_1] : memref<2x8x32xf32, #tpu.memory_space<vmem>>, vector<2x8x32xf32>
    %c0_2 = arith.constant 0 : index
    %c0_3 = arith.constant 0 : index
    %c0_4 = arith.constant 0 : index
    %1 = vector.load %arg2[%c0_2, %c0_3, %c0_4] : memref<2x1x32xf32, #tpu.memory_space<vmem>>, vector<2x1x32xf32>
    %2 = vector.shape_cast %1 : vector<2x1x32xf32> to vector<2x32xf32>
    %3 = vector.shape_cast %0 : vector<2x8x32xf32> to vector<16x32xf32>
    %c0_5 = arith.constant 0 : index
    %c0_6 = arith.constant 0 : index
    %4 = vector.load %arg3[%c0_5, %c0_6] : memref<64x32xf32, #tpu.memory_space<vmem>>, vector<64x32xf32>
    %cst = arith.constant dense<0.000000e+00> : vector<16x64xf32>
    %5 = tpu.matmul %3, %4, %cst {dimension_numbers = #tpu.dot_dimension_numbers<[1], [1], [0], [0], [0, 0, 1, 0], [], []>} : vector<16x32xf32>, vector<64x32xf32>, vector<16x64xf32> -> vector<16x64xf32>
    %c0_7 = arith.constant 0 : index
    %c0_8 = arith.constant 0 : index
    %6 = vector.load %arg4[%c0_7, %c0_8] : memref<64x32xf32, #tpu.memory_space<vmem>>, vector<64x32xf32>
    %cst_9 = arith.constant dense<0.000000e+00> : vector<2x64xf32>
    %7 = tpu.matmul %2, %6, %cst_9 {dimension_numbers = #tpu.dot_dimension_numbers<[1], [1], [0], [0], [0, 0, 1, 0], [], []>} : vector<2x32xf32>, vector<64x32xf32>, vector<2x64xf32> -> vector<2x64xf32>
    %8 = vector.shape_cast %5 : vector<16x64xf32> to vector<2x8x64xf32>
    %9 = vector.shape_cast %7 : vector<2x64xf32> to vector<2x1x64xf32>
    %10 = vector.broadcast %9 : vector<2x1x64xf32> to vector<2x8x64xf32>
    %11 = arith.addf %8, %10 : vector<2x8x64xf32>
    %12 = math.tanh %11 : vector<2x8x64xf32>
    %c0_10 = arith.constant 0 : index
    %c0_11 = arith.constant 0 : index
    %13 = vector.load %arg5[%c0_10, %c0_11] : memref<1x64xf32, #tpu.memory_space<vmem>>, vector<1x64xf32>
    %14 = vector.shape_cast %13 : vector<1x64xf32> to vector<1x1x64xf32>
    %15 = vector.broadcast %14 : vector<1x1x64xf32> to vector<2x8x64xf32>
    %16 = arith.mulf %12, %15 : vector<2x8x64xf32>
    %cst_12 = arith.constant dense<0.000000e+00> : vector<2x8xf32>
    %17 = vector.multi_reduction <add>, %16, %cst_12 [2] : vector<2x8x64xf32> to vector<2x8xf32>
    %cst_13 = arith.constant dense<0xFF800000> : vector<2xf32>
    %18 = vector.multi_reduction <maximumf>, %17, %cst_13 [1] : vector<2x8xf32> to vector<2xf32>
    %19 = vector.shape_cast %18 : vector<2xf32> to vector<2x1xf32>
    %20 = vector.broadcast %19 : vector<2x1xf32> to vector<2x8xf32>
    %21 = arith.subf %17, %20 : vector<2x8xf32>
    %22 = math.exp %21 : vector<2x8xf32>
    %cst_14 = arith.constant dense<0.000000e+00> : vector<2xf32>
    %23 = vector.multi_reduction <add>, %22, %cst_14 [1] : vector<2x8xf32> to vector<2xf32>
    %24 = vector.shape_cast %23 : vector<2xf32> to vector<2x1xf32>
    %25 = tpu.reciprocal %24 : vector<2x1xf32> -> vector<2x1xf32>
    %26 = vector.broadcast %25 : vector<2x1xf32> to vector<2x8xf32>
    %27 = arith.mulf %22, %26 : vector<2x8xf32>
    %28 = vector.shape_cast %27 : vector<2x8xf32> to vector<2x1x8xf32>
    "tpu.trace_start"() <{level = 10 : i32, message = "bqs,bse->bqe"}> : () -> ()
    %cst_15 = arith.constant dense<0.000000e+00> : vector<2x1x32xf32>
    %29 = tpu.matmul %28, %0, %cst_15 {dimension_numbers = #tpu.dot_dimension_numbers<[2], [1], [1], [2], [0, 0, 0, 1, 1, 2], [0], [0]>} : vector<2x1x8xf32>, vector<2x8x32xf32>, vector<2x1x32xf32> -> vector<2x1x32xf32>
    "tpu.trace_stop"() : () -> ()
    %c0_16 = arith.constant 0 : index
    %c0_17 = arith.constant 0 : index
    %c0_18 = arith.constant 0 : index
    %30 = vector.load %arg7[%c0_16, %c0_17, %c0_18] : memref<2x1x8xf32, #tpu.memory_space<vmem>>, vector<2x1x8xf32>
    tpu.vector_store %arg7[%c0_16, %c0_17, %c0_18], %28 {strides = array<i32>} : memref<2x1x8xf32, #tpu.memory_space<vmem>>, vector<2x1x8xf32>,
    %c0_19 = arith.constant 0 : index
    %c0_20 = arith.constant 0 : index
    %c0_21 = arith.constant 0 : index
    %31 = vector.load %arg6[%c0_19, %c0_20, %c0_21] : memref<2x1x32xf32, #tpu.memory_space<vmem>>, vector<2x1x32xf32>
    tpu.vector_store %arg6[%c0_19, %c0_20, %c0_21], %29 {strides = array<i32>} : memref<2x1x32xf32, #tpu.memory_space<vmem>>, vector<2x1x32xf32>,
    return
  }
  func.func @transform_0(%arg0: i32) -> (i32, i32, i32) {
    %c0_i32 = arith.constant 0 : i32
    %c0_i32_0 = arith.constant 0 : i32
    %c0_i32_1 = arith.constant 0 : i32
    return %arg0, %c0_i32, %c0_i32_0 : i32, i32, i32
  }
  func.func @transform_1(%arg0: i32) -> (i32, i32, i32) {
    %c0_i32 = arith.constant 0 : i32
    %c0_i32_0 = arith.constant 0 : i32
    %c0_i32_1 = arith.constant 0 : i32
    return %arg0, %c0_i32, %c0_i32_0 : i32, i32, i32
  }
  func.func @transform_2(%arg0: i32) -> (i32, i32) {
    %c0_i32 = arith.constant 0 : i32
    %c0_i32_0 = arith.constant 0 : i32
    %c0_i32_1 = arith.constant 0 : i32
    return %c0_i32, %c0_i32_0 : i32, i32
  }
  func.func @transform_3(%arg0: i32) -> (i32, i32) {
    %c0_i32 = arith.constant 0 : i32
    %c0_i32_0 = arith.constant 0 : i32
    %c0_i32_1 = arith.constant 0 : i32
    return %c0_i32, %c0_i32_0 : i32, i32
  }
  func.func @transform_4(%arg0: i32) -> (i32, i32) {
    %c0_i32 = arith.constant 0 : i32
    %c0_i32_0 = arith.constant 0 : i32
    %c0_i32_1 = arith.constant 0 : i32
    return %c0_i32, %c0_i32_0 : i32, i32
  }
  func.func @transform_5(%arg0: i32) -> (i32, i32, i32) {
    %c0_i32 = arith.constant 0 : i32
    %c0_i32_0 = arith.constant 0 : i32
    %c0_i32_1 = arith.constant 0 : i32
    return %arg0, %c0_i32, %c0_i32_0 : i32, i32, i32
  }
  func.func @transform_6(%arg0: i32) -> (i32, i32, i32) {
    %c0_i32 = arith.constant 0 : i32
    %c0_i32_0 = arith.constant 0 : i32
    %c0_i32_1 = arith.constant 0 : i32
    return %arg0, %c0_i32, %c0_i32_0 : i32, i32, i32
  }
}

</mosaic_0001>

<bundles_post_ra>
// kernel: tpu_custom_call.1
= control target key start
LH: loop header
LB: loop body
LE: loop exit
PB: predicated region body
PF: predicated region fallthrough
CT: control target
= control target key end

     0   :  { %12 = vsyncpa [#allocation3], 0  ;;  %s1563_s0 = inlined_call_operand.vmem [shape: f32[8,8,32], index: 0, kind: input, shape index: {}]   ;;  %s1564_s1 = inlined_call_operand.vmem [shape: f32[8,1,32], index: 1, kind: input, shape index: {}]   ;;  %s1565_s2 = inlined_call_operand.vmem [shape: f32[64,32], index: 2, kind: input, shape index: {}]   ;;  %s1566_s3 = inlined_call_operand.vmem [shape: f32[64,32], index: 3, kind: input, shape index: {}]   ;;  %s1567_s4 = inlined_call_operand.vmem [shape: f32[1,64], index: 4, kind: input, shape index: {}]   ;;  %s1568_s5 = inlined_call_operand.hbm [shape: f32[8,1,32], index: 5, kind: output, shape index: {0}]   ;;  %s1569_s6 = inlined_call_operand.hbm [shape: f32[8,1,8], index: 6, kind: output, shape index: {1}]  }
   0x1   :  { %14 = vsyncpa [#allocation3 + $0x1], 0 }
   0x2   :  { %15 = vsyncpa [#allocation5], 0 }
   0x3   :  { %17 = vsyncpa [#allocation5 + $0x1], 0  ;;  %s1309_s21 = smov 0   ;;  %s1311_s22 = smov 0  }
   0x4   :  { %s1313_s23 = smov 0   ;;  %s1315_s24 = smov 0  }
   0x5 LB: > { %s1330_s25 = sadd.s32 4294967295, %s1263_s24   ;;  %s954_s26 = sadd.s32 4294967294, %s1263_s24   ;;  %s1263_s24 = sphi %s1315_s24, %s1577_s24   ;;  %s1259_s23 = sphi %s1313_s23, %s1576_s23   ;;  %s1255_s22 = sphi %s1311_s22, %s1575_s22   ;;  %s1251_s21 = sphi %s1309_s21, %s1574_s21  }
   0x6   : > { %s1334_s27 = sadd.s32 1, %s1263_s24   ;;  %s145_s28 = sadd.s32 1, %s1259_s23 }
   0x7   : > { %s142_s29 = ssub.s32 %s1263_s24, %s1334_s27  ;;  %p155_p0 = scmp.ne.s32.totalorder %s1259_s23, %s1255_s22 }
   0x8   : > { %p143_p1 = scmp.eq.s32.totalorder %s142_s29, 0  ;;  %p156_p2 = scmp.eq.s32.totalorder %s1330_s25, 3 }
   0x9   : > { %p161_p3 = scmp.ne.s32.totalorder %s1255_s22, %s1251_s21  ;;  %p162_p4 = scmp.eq.s32.totalorder %s954_s26, 3 }
   0xa   : > { %s1345_s30 = scalar_select %p143_p1, %s1259_s23, %s145_s28  }
   0xb   : > { %p1347_p5 = por %p156_p2, %p155_p0  ;;  %p1351_p6 = por %p162_p4, %p161_p3 }
   0xc   : > { %p957_p7 = scmp.ge.s32.totalorder %s1263_s24, 1  ;;  %p232_p8 = scmp.lt.s32.totalorder %s1263_s24, 5 }
   0xe   : > { %p233_p9 = pnand %p957_p7, %p232_p8 }
   0xf   : > { %vm296_vm0 = vcmask (!%p233_p9), 261120   ;;  %v402_v0 = vld [vmem:[%s1566_s3] sm:$0xff] (!%p233_p9)  ;;  %v403_v1 = vld [vmem:[%s1566_s3 + $0x8] sm:$0xff] (!%p233_p9)  ;;  %v1265_v3 = vmov (!%p233_p9), 0.0|0.0   ;;  %s960_s17 = sshll.u32 (!%p233_p9), %s1330_s25, 1  ;;  %v290_v8 = vld [vmem:[%s1565_s2 + $0x10] sm:$0xff] (!%p233_p9)  ;;  %v416_v23 = vlaneseq (!%p233_p9) }
  0x10   : > { %236 = sbr.rel (%p233_p9) target bundleno = 1242 (0x4da), region = 40  ;;  %v288_v2 = vld [vmem:[%s1565_s2] sm:$0xff] (!%p233_p9)  ;;  %1090 = vmatprep.subr.bf16.mxu1 (!%p233_p9), %v1265_v3  ;;  %vm1368_vm1 = vmpackc.low (!%p233_p9), %vm296_vm0, %vm296_vm0  ;;  %v1091_v5 = vpack.c.bf16 (!%p233_p9), %v403_v1, %v402_v0  ;;  %v289_v6 = vld [vmem:[%s1565_s2 + $0x8] sm:$0xff] (!%p233_p9)  ;;  %vm1266_vm2 = vmmov (!%p233_p9), 0   ;;  %v1267_v10 = vmov (!%p233_p9), 0.0   ;;  %p272_p10 = scmp.lt.s32.totalorder (!%p233_p9), %s960_s17, 7 }
  0x11   : > { %v1066_v7 = vpack.c.bf16 (!%p233_p9), %v289_v6, %v288_v2  ;;  %v291_v9 = vld [vmem:[%s1565_s2 + $0x18] sm:$0xff] (!%p233_p9)  ;;  %1053 = vmatprep.mubr.msk.f32.mxu1 (!%p233_p9), %vm1266_vm2, %v1267_v10  ;;  %v404_v12 = vld [vmem:[%s1566_s3 + $0x10] sm:$0xff] (!%p233_p9)  ;;  %v292_v15 = vld [vmem:[%s1565_s2 + $0x20] sm:$0xff] (!%p233_p9)  ;;  %v1268_v21 = vmov (!%p233_p9), 1966171168   ;;  %v1431_v29 = vshrl.u32 (!%p233_p9), %v416_v23, 7 }
  0x12   : > { %1093 = vmatpush3.bf16.xpose.msk.msra.mxu1 (!%p233_p9), %vm1368_vm1, %v1091_v5  ;;  %v1072_v11 = vpack.c.bf16 (!%p233_p9), %v291_v9, %v290_v8  ;;  %v405_v13 = vld [vmem:[%s1566_s3 + $0x18] sm:$0xff] (!%p233_p9)  ;;  %v293_v16 = vld [vmem:[%s1565_s2 + $0x28] sm:$0xff] (!%p233_p9)  ;;  %v406_v19 = vld [vmem:[%s1566_s3 + $0x20] sm:$0xff] (!%p233_p9)  ;;  %v414_v22 = vunpack.c.l.s4 (!%p233_p9), %v1268_v21  ;;  %vm569_vm3 = vcmask (!%p233_p9), 523264   ;;  %v579_v60 = vand.u32 (!%p233_p9), 127, %v416_v23  ;;  %s1466_s28 = sand.u32 (!%p233_p9), 1, %s1255_s22  }
  0x13   : > { %1068 = vmatprep.subr.msk.bf16.mxu0 (!%p233_p9), %vm1368_vm1, %v1066_v7  ;;  %1094 = vmatprep.subr.bf16.mxu1 (!%p233_p9), %v1265_v3  ;;  %v1095_v14 = vpack.c.bf16 (!%p233_p9), %v405_v13, %v404_v12  ;;  %v1078_v18 = vpack.c.bf16 (!%p233_p9), %v293_v16, %v292_v15  ;;  %v407_v20 = vld [vmem:[%s1566_s3 + $0x28] sm:$0xff] (!%p233_p9)  ;;  %v294_v25 = vld [vmem:[%s1565_s2 + $0x30] sm:$0xff] (!%p233_p9)  ;;  %v295_v26 = vld [vmem:[%s1565_s2 + $0x38] sm:$0xff] (!%p233_p9)  ;;  %v548_v43 = vsub.s32 (!%p233_p9), 0, %v1431_v29  ;;  %vm588_vm4 = vcmask (!%p233_p9), 1041409   ;;  %s958_s29 = sshll.u32 (!%p233_p9), %s1466_s28, 1 }
  0x14   : > { %1071 = vmatpush3.bf16.xpose.msk.msra.mxu0 (!%p233_p9), %vm1368_vm1, %v1066_v7  ;;  %v1099_v24 = vpack.c.bf16 (!%p233_p9), %v407_v20, %v406_v19  ;;  %v1084_v27 = vpack.c.bf16 (!%p233_p9), %v295_v26, %v294_v25  ;;  %v415_v28 = vunpack.c.0.s8 (!%p233_p9), %v414_v22  ;;  %v408_v32 = vld [vmem:[%s1566_s3 + $0x30] sm:$0xff] (!%p233_p9)  ;;  %v409_v33 = vld [vmem:[%s1566_s3 + $0x38] sm:$0xff] (!%p233_p9)  ;;  %v982_v53 = vld [vmem:[%s1567_s4] ss:$0 sm:$0xff] (!%p233_p9)  ;;  %v582_v62 = vsub.s32 (!%p233_p9), %v579_v60, %v1431_v29  ;;  %s270_s9 = scalar_lea.vmem (!%p233_p9), [#allocation4], %s958_s29  ;;  %s1270_s18 = smov (!%p233_p9), [#allocation4]  }
  0x15   : > { %1074 = vmatprep.subr.msk.bf16.mxu0 (!%p233_p9), %vm1368_vm1, %v1072_v11  ;;  %v1103_v36 = vpack.c.bf16 (!%p233_p9), %v409_v33, %v408_v32  ;;  %vm591_vm5 = vcmask (!%p233_p9), 58368   ;;  %v1269_v4 = vmov (!%p233_p9), 0   ;;  %v602_v5 = vsub.s32 (!%p233_p9), 1, %v1431_v29  ;;  %s851_s10 = sshll.u32 (!%p233_p9), %s270_s9, 4  ;;  %s1173_s20 = sshll.u32 (!%p233_p9), %s1270_s18, 4  ;;  %s1472_s10 = int_to_ptr.vmem [resolvable:$true] %s851_s10  ;;  %s1174_s20 = int_to_ptr.vmem [resolvable:$false] %s1173_s20 }
  0x16   : > { %v418_v35 = vsub.s32 (!%p233_p9), %v415_v28, %v1431_v29  ;;  %1158 = vset.pattern.permute.xlu0 (!%p233_p9), %v1269_v4  ;;  %1157 = vset.pattern.permute.xlu1 (!%p233_p9), %v1269_v4  ;;  %vm810_vm6 = vcmask (!%p233_p9), 57344   ;;  %vm655_vm7 = vcmask (!%p233_p9), 64512   ;;  %s1169_s16 = scalar_lea.vmem (!%p233_p9), %s1472_s10, 32  ;;  %s1175_s26 = scalar_lea.vmem (!%p233_p9), %s1174_s20, 64 }
  0x17   : > { %s1579_s17 = smov (!%p272_p10, %s960_s17), 7  ;;  %p1170_p11 = scmp.ne.s32.totalorder %s1472_s10, %s1169_s16 }
  0x18   : > { %s961_s11 = sshll.u32 %s1579_s17, 3  ;;  %s280_s15 = scalar_lea.vmem %s1564_s1, %s1579_s17 }
  0x19   : > { %s1406_s19 = scalar_lea.vmem %s1563_s0, %s961_s11  ;;  %v286_v30 = vld [vmem:[%s280_s15] sm:$0x1]  ;;  %v287_v31 = vld [vmem:[%s280_s15 + $0x1] sm:$0x1]  ;;  %s993_s11 = sshll.u32 %s1330_s25, 5 }
  0x1a   : > { %v284_v17 = vld [vmem:[%s1406_s19] sm:$0xff]  ;;  %1097 = vmatpush3.bf16.xpose.msk.msra.mxu1 %vm1368_vm1, %v1095_v14  ;;  %v412_v34 = vcombine.low %v286_v30, %v287_v31  ;;  %v285_v39 = vld [vmem:[%s1406_s19 + $0x8] sm:$0xff]  ;;  %s1479_s14 = scalar_lea.hbm %s1569_s6, %s993_s11  ;;  %s822_s15 = scalar_lea.sflag [#allocation5], %s1466_s28 }
  0x1b   : > { %1034 = vmatprep.mubr.msk.f32.mxu0 %vm296_vm0, %v284_v17  ;;  %1098 = vmatprep.subr.bf16.mxu1 %v1265_v3  ;;  %p1171_p12 = pnand %p1170_p11, %p1347_p5  ;;  %p1176_p0 = scmp.lt.s32.totalorder %s1472_s10, %s1174_s20 }
  0x1c   : > { %1077 = vmatpush3.bf16.xpose.msk.msra.mxu0 %vm1368_vm1, %v1072_v11  ;;  %v419_v37 = vrot.slane %v412_v34, %v418_v35  ;;  %p1177_p1 = scmp.lt.s32.totalorder %s1175_s26, %s1169_s16 }
  0x1d   : > { %1080 = vmatprep.subr.msk.bf16.mxu0 %vm1368_vm1, %v1078_v18  ;;  %p1172_p13 = pneg %p1171_p12 }
  0x1e   : > { %v426_v38 = vrot.slane %v419_v37, %v418_v35  ;;  %p1178_p2 = por %p1177_p1, %p1176_p0 }
  0x20   : > { %p1179_p3 = pnand %p1178_p2, %p1172_p13 }
  0x22   : > { %1101 = vmatpush3.bf16.xpose.msk.msra.mxu1 %vm1368_vm1, %v1099_v24 }
  0x23   : > { %1102 = vmatprep.subr.bf16.mxu1 %v1265_v3 }
  0x24   : > { %1083 = vmatpush3.bf16.xpose.msk.msra.mxu0 %vm1368_vm1, %v1078_v18 }
  0x25   : > { %1086 = vmatprep.subr.msk.bf16.mxu0 %vm1368_vm1, %v1084_v27 }
  0x2a   : > { %1105 = vmatpush3.bf16.xpose.msk.msra.mxu1 %vm1368_vm1, %v1103_v36 }
  0x2b   : > { %1061 = vmatprep.subr.mxu1 %v1267_v10 }
  0x2c   : > { %1089 = vmatpush3.bf16.xpose.msk.msra.mxu0 %vm1368_vm1, %v1084_v27 }
  0x2d   : > { %1056 = vmatprep.subr.mxu0 %v1267_v10 }
  0x31   : > { %1054 = vmatmul.mubr.msk.f32.vlgmr.msra.gmra.mrb[0].mxu1 %vm296_vm0, %v426_v38 }
  0x32   : > { %1062 = vmatpush3.msra.mxu1 %v285_v39  ;;  %1063 = vmatprep.mubr.msk.f32.mxu1 %vm1266_vm2, %v1267_v10 }
  0x33   : > { %1035 = vmatmul.mubr.msk.f32.vlgmr.msra.gmra.mrb[0].mxu0 %vm296_vm0, %v285_v39 }
  0x34   : > { %1057 = vmatpush3.msra.mxu0 %v284_v17  ;;  %1058 = vmatprep.mubr.msk.f32.mxu0 %vm1266_vm2, %v1267_v10 }
 0x104   : > { %v519_v40 = vpop.f32.mrb[0].mxu1 }
 0x105   : > { %v530_v41 = vrot.slane %v519_v40, %v418_v35  ;;  %v1055_v42 = vpop.f32.mrb[1].mxu1 }
 0x106   : > { %v1036_v44 = vpop.f32.mrb[0].mxu0 }
 0x107   : > { %v531_v45 = vcombine.high %v530_v41, %v530_v41  ;;  %v538_v46 = vrot.slane %v530_v41, %v418_v35  ;;  %v393_v47 = vpop.f32.mrb[1].mxu0 }
 0x109   : > { %v545_v48 = vrot.slane %v531_v45, %v418_v35  ;;  %v549_v49 = vrot.slane %v538_v46, %v548_v43 }
 0x10b   : > { %v553_v50 = vrot.slane %v545_v48, %v548_v43  ;;  %v556_v51 = vadd.f32 %v549_v49, %v393_v47 }
 0x10d   : > { %v557_v52 = vadd.f32 %v1036_v44, %v553_v50  ;;  %1159 = vtanh.f32 %v556_v51 }
 0x10f   : > { %1161 = vtanh.f32 %v557_v52 }
 0x117   : > { %v1160_v54 = vpop.eup %1159 }
 0x118   : > { %v567_v55 = vmul.f32 %v1160_v54, %v982_v53 }
 0x119   : > { %v1162_v56 = vpop.eup %1161 }
 0x11a   : > { %v570_v57 = vsel %vm569_vm3, %v567_v55, 0.0  ;;  %v568_v58 = vmul.f32 %v1162_v56, %v982_v53 }
 0x11b   : > { %571 = vadd.xlane.f32.xlu0 %v570_v57 }
 0x11c   : > { %v573_v59 = vsel %vm569_vm3, %v568_v58, 0.0 }
 0x11f   : > { %574 = vadd.xlane.f32.xlu0 %v573_v59 }
 0x1a8   : > { %v572_v61 = vpop.xlane.xlu0 %571 }
 0x1a9   : > { %v583_v0 = vrot.slane %v572_v61, %v582_v62 }
 0x1ac   : > { %v575_v63 = vpop.xlane.xlu0 %574 }
 0x1ad   : > { %v587_v1 = vrot.slane %v575_v63, %v582_v62 }
 0x1af   : > { %v589_v2 = vsel %vm588_vm4, %v587_v1, %v583_v0 }
 0x1b0   : > { %v592_v3 = vsel %vm591_vm5, %v589_v2, -inf }
 0x1b1   : > { %593 = vmax.xlane.f32.xlu1 %v592_v3 }
 0x23e   : > { %v594_v6 = vpop.xlane.xlu1 %593 }
 0x23f   : > { %v599_v7 = vrot.slane %v594_v6, %v548_v43  ;;  %v603_v8 = vrot.slane %v594_v6, %v602_v5 }
 0x241   : > { %v606_v9 = vsub.f32 %v572_v61, %v599_v7  ;;  %v607_v10 = vsub.f32 %v575_v63, %v603_v8 }
 0x243   : > { %v608_v11 = vmul.f32 1.442695, %v606_v9  ;;  %v610_v12 = vmul.f32 1.442695, %v607_v10 }
 0x245   : > { %1163 = vpow2.f32 %v608_v11 }
 0x246   : > { %1165 = vpow2.f32 %v610_v12 }
 0x24f   : > { %v1164_v13 = vpop.eup %1163 }
 0x250   : > { %v1166_v14 = vpop.eup %1165  ;;  %615 = vperm.xlu1 %1157, %v1164_v13  }
 0x251   : > { %618 = vperm.xlu0 %1158, %v1166_v14  }
 0x2cf   : > { %v616_v15 = vpop.permute.xlu1 %615 }
 0x2d0   : > { %v619_v16 = vpop.permute.xlu0 %618  ;;  %v623_v17 = vrot.slane %v616_v15, %v582_v62 }
 0x2d1   : > { %v627_v18 = vrot.slane %v619_v16, %v582_v62 }
 0x2d3   : > { %v628_v19 = vsel %vm588_vm4, %v627_v18, %v623_v17 }
 0x2d4   : > { %v630_v20 = vsel %vm591_vm5, %v628_v19, 0.0 }
 0x2d5   : > { %631 = vadd.xlane.f32.xlu1 %v630_v20 }
 0x362   : > { %v632_v21 = vpop.xlane.xlu1 %631 }
 0x363   : > { %1167 = vrcp.f32 %v632_v21 }
 0x36d   : > { %v1168_v22 = vpop.eup %1167 }
 0x36e   : > { %v638_v23 = vrot.slane %v1168_v22, %v548_v43  ;;  %v642_v25 = vrot.slane %v1168_v22, %v602_v5 }
 0x370   : > { %v645_v24 = vmul.f32 %v1164_v13, %v638_v23  ;;  %v646_v26 = vmul.f32 %v1166_v14, %v642_v25 }
 0x372   : > { %649 = vperm.xlu0 %1158, %v645_v24  }
 0x376   : > { %730 = vperm.xlu0 %1158, %v646_v26  }
 0x3f1   : > { %v650_v27 = vpop.permute.xlu0 %649 }
 0x3f2   : > { %v654_v28 = vrot.slane %v650_v27, %v582_v62 }
 0x3f4   : > { %811 = vst.msk [vmem:[%s270_s9] sm:$0x1] %vm810_vm6, %v654_v28  ;;  %1059 = vmatmul.mubr.msk.f32.vlgmr.msra.gmra.mrb[2].mxu0 %vm655_vm7, %v654_v28 }
 0x3f5   : > { %v731_v29 = vpop.permute.xlu0 %730 }
 0x3f6   : > { %v735_v30 = vrot.slane %v731_v29, %v582_v62 }
 0x3f8   : > { %812 = vst.msk [vmem:[%s270_s9 + $0x1] sm:$0x1] %vm810_vm6, %v735_v30  ;;  %1064 = vmatmul.mubr.msk.f32.vlgmr.msra.gmra.mrb[2].mxu1 %vm655_vm7, %v735_v30 }
 0x3f9   : > { %1182 = shalt.err (!%p1179_p3)
}
 0x3fa   : > { %s1183_s17 = scalar_lea.hbm %s1479_s14, 32  ;;  %s1187_s12 = scalar_lea.hbm %s1569_s6, 128 }
 0x3fb   : > { %p1184_p4 = scmp.ne.s32.totalorder %s1479_s14, %s1183_s17  ;;  %p1188_p9 = scmp.lt.u32.totalorder %s1479_s14, %s1569_s6 }
 0x3fc   : > { %p1189_p10 = scmp.lt.u32.totalorder %s1187_s12, %s1183_s17  ;;  %p1191_p12 = scmp.lt.u32.totalorder %s1183_s17, %s1479_s14 }
 0x3fd   : > { %p1185_p7 = pnand %p1184_p4, %p1347_p5 }
 0x3fe   : > { %p1190_p11 = por %p1189_p10, %p1188_p9 }
 0x3ff   : > { %p1186_p8 = pneg %p1185_p7 }
 0x400   : > { %p1192_p13 = por %p1191_p12, %p1190_p11 }
 0x402   : > { %p1193_p0 = pnand %p1192_p13, %p1186_p8 }
 0x404   : > { %1196 = shalt.err (!%p1193_p0)
}
 0x405   : > { %s1271_s16 = smov 16   ;;  %s1272_s20 = smov 1   ;;  %vm813_vm8 = vcmask 253952  }
 0x406   : > { %1107 = dma.vmem_to_hbm [thread:$0]  (%p1347_p5), %s1472_s10, 32, %s1479_s14, %s822_s15, %s1271_s16, %s1271_s16, %s1272_s20  }
 0x407   : > { %s263_s26 = scalar_lea.vmem [#allocation2], %s958_s29  ;;  %s1517_s12 = scalar_lea.hbm %s1568_s5, %s993_s11 }
 0x408   : > { %s835_s17 = sshll.u32 %s263_s26, 4  ;;  %s817_s10 = scalar_lea.sflag [#allocation3], %s1466_s28  ;;  %s1510_s17 = int_to_ptr.vmem [resolvable:$true] %s835_s17 }
 0x409   : > { %s1197_s29 = scalar_lea.vmem %s1510_s17, 32  ;;  %s1273_s14 = smov [#allocation2]  }
 0x40a   : > { %p1198_p1 = scmp.ne.s32.totalorder %s1510_s17, %s1197_s29  ;;  %s1201_s15 = sshll.u32 %s1273_s14, 4  ;;  %s1202_s15 = int_to_ptr.vmem [resolvable:$false] %s1201_s15 }
 0x40b   : > { %s1203_s25 = scalar_lea.vmem %s1202_s15, 64  ;;  %p1204_p4 = scmp.lt.s32.totalorder %s1510_s17, %s1202_s15 }
 0x40c   : > { %p1199_p2 = pnand %p1198_p1, %p1347_p5  ;;  %p1205_p7 = scmp.lt.s32.totalorder %s1203_s25, %s1197_s29 }
 0x40e   : > { %p1200_p3 = pneg %p1199_p2  ;;  %p1206_p8 = por %p1205_p7, %p1204_p4 }
 0x410   : > { %p1207_p9 = pnand %p1206_p8, %p1200_p3 }
 0x4c7   : > { %v724_v31 = vpop.f32.mrb[2].mxu0 }
 0x4c8   : > { %814 = vst.msk [vmem:[%s263_s26] sm:$0x1] %vm813_vm8, %v724_v31  ;;  %v1060_v32 = vpop.f32.mrb[3].mxu0 }
 0x4cb   : > { %v804_v33 = vpop.f32.mrb[2].mxu1 }
 0x4cc   : > { %815 = vst.msk [vmem:[%s263_s26 + $0x1] sm:$0x1] %vm813_vm8, %v804_v33  ;;  %v1065_v34 = vpop.f32.mrb[3].mxu1 }
 0x4cd   : > { %1210 = shalt.err (!%p1207_p9)
}
 0x4ce   : > { %s1211_s11 = scalar_lea.hbm %s1517_s12, 32  ;;  %s1215_s26 = scalar_lea.hbm %s1568_s5, 128 }
 0x4cf   : > { %p1212_p10 = scmp.ne.s32.totalorder %s1517_s12, %s1211_s11  ;;  %p1216_p13 = scmp.lt.u32.totalorder %s1517_s12, %s1568_s5 }
 0x4d0   : > { %p1217_p0 = scmp.lt.u32.totalorder %s1215_s26, %s1211_s11  ;;  %p1219_p2 = scmp.lt.u32.totalorder %s1211_s11, %s1517_s12 }
 0x4d1   : > { %p1213_p11 = pnand %p1212_p10, %p1347_p5 }
 0x4d2   : > { %p1218_p1 = por %p1217_p0, %p1216_p13 }
 0x4d3   : > { %p1214_p12 = pneg %p1213_p11 }
 0x4d4   : > { %p1220_p3 = por %p1219_p2, %p1218_p1 }
 0x4d6   : > { %p1221_p4 = pnand %p1220_p3, %p1214_p12 }
 0x4d8   : > { %1224 = shalt.err (!%p1221_p4)
}
 0x4d9   : > { %1106 = dma.vmem_to_hbm [thread:$0]  (%p1347_p5), %s1510_s17, 32, %s1517_s12, %s817_s10, %s1271_s16, %s1271_s16, %s1272_s20  }
 0x4da PF: > { %p1117_p7 = scmp.ge.s32.totalorder %s1263_s24, 2  ;;  %s866_s29 = sand.u32 1, %s1251_s21  }
 0x4db   : > { %s867_s14 = scalar_lea.sflag [#allocation3], %s866_s29 }
 0x4dc   : > { %p1111_p8 = pnand %p1117_p7, %p1351_p6 }
 0x4de   : > { %1242 = dma.done.wait (!%p1111_p8), %s867_s14, 32  }
 0x4df   : > { %1244 = vsyncadd (!%p1111_p8), %s867_s14, 4294967264  ;;  %s876_s7 = scalar_lea.sflag [#allocation5], %s866_s29 }
 0x4e0   : > { %1246 = dma.done.wait (!%p1111_p8), %s876_s7, 32  }
 0x4e1   : > { %1248 = vsyncadd (!%p1111_p8), %s876_s7, 4294967264  ;;  %p20_p5 = scmp.ge.s32.totalorder %s1334_s27, 6   ;;  %s1574_s21 = smov %s1255_s22 }
 0x4e2   : > { %s1575_s22 = smov %s1259_s23  ;;  %s1576_s23 = smov %s1345_s30 }
 0x4e3   : > { %s1577_s24 = smov %s1334_s27  ;;  %22 = sbr.rel (!%p20_p5) target bundleno = 5 (0x5), region = 95 }
 0x4ea   :  { %881 = vsyncpa [#allocation3], 1 }
 0x4eb   :  { %883 = vsyncpa [#allocation3 + $0x1], 1 }
 0x4ec   :  { %884 = vsyncpa [#allocation5], 1 }
 0x4ed   :  { %886 = vsyncpa [#allocation5 + $0x1], 1 }

// kernel: tpu_custom_call.1
= control target key start
LH: loop header
LB: loop body
LE: loop exit
PB: predicated region body
PF: predicated region fallthrough
CT: control target
= control target key end

     0   :  { %12 = vsyncpa [#allocation3], 0  ;;  %s1563_s0 = inlined_call_operand.vmem [shape: f32[8,8,32], index: 0, kind: input, shape index: {}]   ;;  %s1564_s1 = inlined_call_operand.vmem [shape: f32[8,1,32], index: 1, kind: input, shape index: {}]   ;;  %s1565_s2 = inlined_call_operand.vmem [shape: f32[64,32], index: 2, kind: input, shape index: {}]   ;;  %s1566_s3 = inlined_call_operand.vmem [shape: f32[64,32], index: 3, kind: input, shape index: {}]   ;;  %s1567_s4 = inlined_call_operand.vmem [shape: f32[1,64], index: 4, kind: input, shape index: {}]   ;;  %s1568_s5 = inlined_call_operand.hbm [shape: f32[8,1,32], index: 5, kind: output, shape index: {0}]   ;;  %s1569_s6 = inlined_call_operand.hbm [shape: f32[8,1,8], index: 6, kind: output, shape index: {1}]  }
   0x1   :  { %14 = vsyncpa [#allocation3 + $0x1], 0 }
   0x2   :  { %15 = vsyncpa [#allocation5], 0 }
   0x3   :  { %17 = vsyncpa [#allocation5 + $0x1], 0  ;;  %s1309_s21 = smov 0   ;;  %s1311_s22 = smov 0  }
   0x4   :  { %s1313_s23 = smov 0   ;;  %s1315_s24 = smov 0  }
   0x5 LB: > { %s1330_s25 = sadd.s32 4294967295, %s1263_s24   ;;  %s954_s26 = sadd.s32 4294967294, %s1263_s24   ;;  %s1263_s24 = sphi %s1315_s24, %s1577_s24   ;;  %s1259_s23 = sphi %s1313_s23, %s1576_s23   ;;  %s1255_s22 = sphi %s1311_s22, %s1575_s22   ;;  %s1251_s21 = sphi %s1309_s21, %s1574_s21  }
   0x6   : > { %s1334_s27 = sadd.s32 1, %s1263_s24   ;;  %s145_s28 = sadd.s32 1, %s1259_s23 }
   0x7   : > { %s142_s29 = ssub.s32 %s1263_s24, %s1334_s27  ;;  %p155_p0 = scmp.ne.s32.totalorder %s1259_s23, %s1255_s22 }
   0x8   : > { %p143_p1 = scmp.eq.s32.totalorder %s142_s29, 0  ;;  %p156_p2 = scmp.eq.s32.totalorder %s1330_s25, 3 }
   0x9   : > { %p161_p3 = scmp.ne.s32.totalorder %s1255_s22, %s1251_s21  ;;  %p162_p4 = scmp.eq.s32.totalorder %s954_s26, 3 }
   0xa   : > { %s1345_s30 = scalar_select %p143_p1, %s1259_s23, %s145_s28  }
   0xb   : > { %p1347_p5 = por %p156_p2, %p155_p0  ;;  %p1351_p6 = por %p162_p4, %p161_p3 }
   0xc   : > { %p957_p7 = scmp.ge.s32.totalorder %s1263_s24, 1  ;;  %p232_p8 = scmp.lt.s32.totalorder %s1263_s24, 5 }
   0xe   : > { %p233_p9 = pnand %p957_p7, %p232_p8 }
   0xf   : > { %vm296_vm0 = vcmask (!%p233_p9), 261120   ;;  %v402_v0 = vld [vmem:[%s1566_s3] sm:$0xff] (!%p233_p9)  ;;  %v403_v1 = vld [vmem:[%s1566_s3 + $0x8] sm:$0xff] (!%p233_p9)  ;;  %v1265_v3 = vmov (!%p233_p9), 0.0|0.0   ;;  %s960_s17 = sshll.u32 (!%p233_p9), %s1330_s25, 1  ;;  %v290_v8 = vld [vmem:[%s1565_s2 + $0x10] sm:$0xff] (!%p233_p9)  ;;  %v416_v23 = vlaneseq (!%p233_p9) }
  0x10   : > { %236 = sbr.rel (%p233_p9) target bundleno = 1242 (0x4da), region = 40  ;;  %v288_v2 = vld [vmem:[%s1565_s2] sm:$0xff] (!%p233_p9)  ;;  %1090 = vmatprep.subr.bf16.mxu1 (!%p233_p9), %v1265_v3  ;;  %vm1368_vm1 = vmpackc.low (!%p233_p9), %vm296_vm0, %vm296_vm0  ;;  %v1091_v5 = vpack.c.bf16 (!%p233_p9), %v403_v1, %v402_v0  ;;  %v289_v6 = vld [vmem:[%s1565_s2 + $0x8] sm:$0xff] (!%p233_p9)  ;;  %vm1266_vm2 = vmmov (!%p233_p9), 0   ;;  %v1267_v10 = vmov (!%p233_p9), 0.0   ;;  %p272_p10 = scmp.lt.s32.totalorder (!%p233_p9), %s960_s17, 7 }
  0x11   : > { %v1066_v7 = vpack.c.bf16 (!%p233_p9), %v289_v6, %v288_v2  ;;  %v291_v9 = vld [vmem:[%s1565_s2 + $0x18] sm:$0xff] (!%p233_p9)  ;;  %1053 = vmatprep.mubr.msk.f32.mxu1 (!%p233_p9), %vm1266_vm2, %v1267_v10  ;;  %v404_v12 = vld [vmem:[%s1566_s3 + $0x10] sm:$0xff] (!%p233_p9)  ;;  %v292_v15 = vld [vmem:[%s1565_s2 + $0x20] sm:$0xff] (!%p233_p9)  ;;  %v1268_v21 = vmov (!%p233_p9), 1966171168   ;;  %v1431_v29 = vshrl.u32 (!%p233_p9), %v416_v23, 7 }
  0x12   : > { %1093 = vmatpush3.bf16.xpose.msk.msra.mxu1 (!%p233_p9), %vm1368_vm1, %v1091_v5  ;;  %v1072_v11 = vpack.c.bf16 (!%p233_p9), %v291_v9, %v290_v8  ;;  %v405_v13 = vld [vmem:[%s1566_s3 + $0x18] sm:$0xff] (!%p233_p9)  ;;  %v293_v16 = vld [vmem:[%s1565_s2 + $0x28] sm:$0xff] (!%p233_p9)  ;;  %v406_v19 = vld [vmem:[%s1566_s3 + $0x20] sm:$0xff] (!%p233_p9)  ;;  %v414_v22 = vunpack.c.l.s4 (!%p233_p9), %v1268_v21  ;;  %vm569_vm3 = vcmask (!%p233_p9), 523264   ;;  %v579_v60 = vand.u32 (!%p233_p9), 127, %v416_v23  ;;  %s1466_s28 = sand.u32 (!%p233_p9), 1, %s1255_s22  }
  0x13   : > { %1068 = vmatprep.subr.msk.bf16.mxu0 (!%p233_p9), %vm1368_vm1, %v1066_v7  ;;  %1094 = vmatprep.subr.bf16.mxu1 (!%p233_p9), %v1265_v3  ;;  %v1095_v14 = vpack.c.bf16 (!%p233_p9), %v405_v13, %v404_v12  ;;  %v1078_v18 = vpack.c.bf16 (!%p233_p9), %v293_v16, %v292_v15  ;;  %v407_v20 = vld [vmem:[%s1566_s3 + $0x28] sm:$0xff] (!%p233_p9)  ;;  %v294_v25 = vld [vmem:[%s1565_s2 + $0x30] sm:$0xff] (!%p233_p9)  ;;  %v295_v26 = vld [vmem:[%s1565_s2 + $0x38] sm:$0xff] (!%p233_p9)  ;;  %v548_v43 = vsub.s32 (!%p233_p9), 0, %v1431_v29  ;;  %vm588_vm4 = vcmask (!%p233_p9), 1041409   ;;  %s958_s29 = sshll.u32 (!%p233_p9), %s1466_s28, 1 }
  0x14   : > { %1071 = vmatpush3.bf16.xpose.msk.msra.mxu0 (!%p233_p9), %vm1368_vm1, %v1066_v7  ;;  %v1099_v24 = vpack.c.bf16 (!%p233_p9), %v407_v20, %v406_v19  ;;  %v1084_v27 = vpack.c.bf16 (!%p233_p9), %v295_v26, %v294_v25  ;;  %v415_v28 = vunpack.c.0.s8 (!%p233_p9), %v414_v22  ;;  %v408_v32 = vld [vmem:[%s1566_s3 + $0x30] sm:$0xff] (!%p233_p9)  ;;  %v409_v33 = vld [vmem:[%s1566_s3 + $0x38] sm:$0xff] (!%p233_p9)  ;;  %v982_v53 = vld [vmem:[%s1567_s4] ss:$0 sm:$0xff] (!%p233_p9)  ;;  %v582_v62 = vsub.s32 (!%p233_p9), %v579_v60, %v1431_v29  ;;  %s270_s9 = scalar_lea.vmem (!%p233_p9), [#allocation4], %s958_s29  ;;  %s1270_s18 = smov (!%p233_p9), [#allocation4]  }
  0x15   : > { %1074 = vmatprep.subr.msk.bf16.mxu0 (!%p233_p9), %vm1368_vm1, %v1072_v11  ;;  %v1103_v36 = vpack.c.bf16 (!%p233_p9), %v409_v33, %v408_v32  ;;  %vm591_vm5 = vcmask (!%p233_p9), 58368   ;;  %v1269_v4 = vmov (!%p233_p9), 0   ;;  %v602_v5 = vsub.s32 (!%p233_p9), 1, %v1431_v29  ;;  %s851_s10 = sshll.u32 (!%p233_p9), %s270_s9, 4  ;;  %s1173_s20 = sshll.u32 (!%p233_p9), %s1270_s18, 4  ;;  %s1472_s10 = int_to_ptr.vmem [resolvable:$true] %s851_s10  ;;  %s1174_s20 = int_to_ptr.vmem [resolvable:$false] %s1173_s20 }
  0x16   : > { %v418_v35 = vsub.s32 (!%p233_p9), %v415_v28, %v1431_v29  ;;  %1158 = vset.pattern.permute.xlu0 (!%p233_p9), %v1269_v4  ;;  %1157 = vset.pattern.permute.xlu1 (!%p233_p9), %v1269_v4  ;;  %vm810_vm6 = vcmask (!%p233_p9), 57344   ;;  %vm655_vm7 = vcmask (!%p233_p9), 64512   ;;  %s1169_s16 = scalar_lea.vmem (!%p233_p9), %s1472_s10, 32  ;;  %s1175_s26 = scalar_lea.vmem (!%p233_p9), %s1174_s20, 64 }
  0x17   : > { %s1579_s17 = smov (!%p272_p10, %s960_s17), 7  ;;  %p1170_p11 = scmp.ne.s32.totalorder %s1472_s10, %s1169_s16 }
  0x18   : > { %s961_s11 = sshll.u32 %s1579_s17, 3  ;;  %s280_s15 = scalar_lea.vmem %s1564_s1, %s1579_s17 }
  0x19   : > { %s1406_s19 = scalar_lea.vmem %s1563_s0, %s961_s11  ;;  %v286_v30 = vld [vmem:[%s280_s15] sm:$0x1]  ;;  %v287_v31 = vld [vmem:[%s280_s15 + $0x1] sm:$0x1]  ;;  %s993_s11 = sshll.u32 %s1330_s25, 5 }
  0x1a   : > { %v284_v17 = vld [vmem:[%s1406_s19] sm:$0xff]  ;;  %1097 = vmatpush3.bf16.xpose.msk.msra.mxu1 %vm1368_vm1, %v1095_v14  ;;  %v412_v34 = vcombine.low %v286_v30, %v287_v31  ;;  %v285_v39 = vld [vmem:[%s1406_s19 + $0x8] sm:$0xff]  ;;  %s1479_s14 = scalar_lea.hbm %s1569_s6, %s993_s11  ;;  %s822_s15 = scalar_lea.sflag [#allocation5], %s1466_s28 }
  0x1b   : > { %1034 = vmatprep.mubr.msk.f32.mxu0 %vm296_vm0, %v284_v17  ;;  %1098 = vmatprep.subr.bf16.mxu1 %v1265_v3  ;;  %p1171_p12 = pnand %p1170_p11, %p1347_p5  ;;  %p1176_p0 = scmp.lt.s32.totalorder %s1472_s10, %s1174_s20 }
  0x1c   : > { %1077 = vmatpush3.bf16.xpose.msk.msra.mxu0 %vm1368_vm1, %v1072_v11  ;;  %v419_v37 = vrot.slane %v412_v34, %v418_v35  ;;  %p1177_p1 = scmp.lt.s32.totalorder %s1175_s26, %s1169_s16 }
  0x1d   : > { %1080 = vmatprep.subr.msk.bf16.mxu0 %vm1368_vm1, %v1078_v18  ;;  %p1172_p13 = pneg %p1171_p12 }
  0x1e   : > { %v426_v38 = vrot.slane %v419_v37, %v418_v35  ;;  %p1178_p2 = por %p1177_p1, %p1176_p0 }
  0x20   : > { %p1179_p3 = pnand %p1178_p2, %p1172_p13 }
  0x22   : > { %1101 = vmatpush3.bf16.xpose.msk.msra.mxu1 %vm1368_vm1, %v1099_v24 }
  0x23   : > { %1102 = vmatprep.subr.bf16.mxu1 %v1265_v3 }
  0x24   : > { %1083 = vmatpush3.bf16.xpose.msk.msra.mxu0 %vm1368_vm1, %v1078_v18 }
  0x25   : > { %1086 = vmatprep.subr.msk.bf16.mxu0 %vm1368_vm1, %v1084_v27 }
  0x2a   : > { %1105 = vmatpush3.bf16.xpose.msk.msra.mxu1 %vm1368_vm1, %v1103_v36 }
  0x2b   : > { %1061 = vmatprep.subr.mxu1 %v1267_v10 }
  0x2c   : > { %1089 = vmatpush3.bf16.xpose.msk.msra.mxu0 %vm1368_vm1, %v1084_v27 }
  0x2d   : > { %1056 = vmatprep.subr.mxu0 %v1267_v10 }
  0x31   : > { %1054 = vmatmul.mubr.msk.f32.vlgmr.msra.gmra.mrb[0].mxu1 %vm296_vm0, %v426_v38 }
  0x32   : > { %1062 = vmatpush3.msra.mxu1 %v285_v39  ;;  %1063 = vmatprep.mubr.msk.f32.mxu1 %vm1266_vm2, %v1267_v10 }
  0x33   : > { %1035 = vmatmul.mubr.msk.f32.vlgmr.msra.gmra.mrb[0].mxu0 %vm296_vm0, %v285_v39 }
  0x34   : > { %1057 = vmatpush3.msra.mxu0 %v284_v17  ;;  %1058 = vmatprep.mubr.msk.f32.mxu0 %vm1266_vm2, %v1267_v10 }
 0x104   : > { %v519_v40 = vpop.f32.mrb[0].mxu1 }
 0x105   : > { %v530_v41 = vrot.slane %v519_v40, %v418_v35  ;;  %v1055_v42 = vpop.f32.mrb[1].mxu1 }
 0x106   : > { %v1036_v44 = vpop.f32.mrb[0].mxu0 }
 0x107   : > { %v531_v45 = vcombine.high %v530_v41, %v530_v41  ;;  %v538_v46 = vrot.slane %v530_v41, %v418_v35  ;;  %v393_v47 = vpop.f32.mrb[1].mxu0 }
 0x109   : > { %v545_v48 = vrot.slane %v531_v45, %v418_v35  ;;  %v549_v49 = vrot.slane %v538_v46, %v548_v43 }
 0x10b   : > { %v553_v50 = vrot.slane %v545_v48, %v548_v43  ;;  %v556_v51 = vadd.f32 %v549_v49, %v393_v47 }
 0x10d   : > { %v557_v52 = vadd.f32 %v1036_v44, %v553_v50  ;;  %1159 = vtanh.f32 %v556_v51 }
 0x10f   : > { %1161 = vtanh.f32 %v557_v52 }
 0x117   : > { %v1160_v54 = vpop.eup %1159 }
 0x118   : > { %v567_v55 = vmul.f32 %v1160_v54, %v982_v53 }
 0x119   : > { %v1162_v56 = vpop.eup %1161 }
 0x11a   : > { %v570_v57 = vsel %vm569_vm3, %v567_v55, 0.0  ;;  %v568_v58 = vmul.f32 %v1162_v56, %v982_v53 }
 0x11b   : > { %571 = vadd.xlane.f32.xlu0 %v570_v57 }
 0x11c   : > { %v573_v59 = vsel %vm569_vm3, %v568_v58, 0.0 }
 0x11f   : > { %574 = vadd.xlane.f32.xlu0 %v573_v59 }
 0x1a8   : > { %v572_v61 = vpop.xlane.xlu0 %571 }
 0x1a9   : > { %v583_v0 = vrot.slane %v572_v61, %v582_v62 }
 0x1ac   : > { %v575_v63 = vpop.xlane.xlu0 %574 }
 0x1ad   : > { %v587_v1 = vrot.slane %v575_v63, %v582_v62 }
 0x1af   : > { %v589_v2 = vsel %vm588_vm4, %v587_v1, %v583_v0 }
 0x1b0   : > { %v592_v3 = vsel %vm591_vm5, %v589_v2, -inf }
 0x1b1   : > { %593 = vmax.xlane.f32.xlu1 %v592_v3 }
 0x23e   : > { %v594_v6 = vpop.xlane.xlu1 %593 }
 0x23f   : > { %v599_v7 = vrot.slane %v594_v6, %v548_v43  ;;  %v603_v8 = vrot.slane %v594_v6, %v602_v5 }
 0x241   : > { %v606_v9 = vsub.f32 %v572_v61, %v599_v7  ;;  %v607_v10 = vsub.f32 %v575_v63, %v603_v8 }
 0x243   : > { %v608_v11 = vmul.f32 1.442695, %v606_v9  ;;  %v610_v12 = vmul.f32 1.442695, %v607_v10 }
 0x245   : > { %1163 = vpow2.f32 %v608_v11 }
 0x246   : > { %1165 = vpow2.f32 %v610_v12 }
 0x24f   : > { %v1164_v13 = vpop.eup %1163 }
 0x250   : > { %v1166_v14 = vpop.eup %1165  ;;  %615 = vperm.xlu1 %1157, %v1164_v13  }
 0x251   : > { %618 = vperm.xlu0 %1158, %v1166_v14  }
 0x2cf   : > { %v616_v15 = vpop.permute.xlu1 %615 }
 0x2d0   : > { %v619_v16 = vpop.permute.xlu0 %618  ;;  %v623_v17 = vrot.slane %v616_v15, %v582_v62 }
 0x2d1   : > { %v627_v18 = vrot.slane %v619_v16, %v582_v62 }
 0x2d3   : > { %v628_v19 = vsel %vm588_vm4, %v627_v18, %v623_v17 }
 0x2d4   : > { %v630_v20 = vsel %vm591_vm5, %v628_v19, 0.0 }
 0x2d5   : > { %631 = vadd.xlane.f32.xlu1 %v630_v20 }
 0x362   : > { %v632_v21 = vpop.xlane.xlu1 %631 }
 0x363   : > { %1167 = vrcp.f32 %v632_v21 }
 0x36d   : > { %v1168_v22 = vpop.eup %1167 }
 0x36e   : > { %v638_v23 = vrot.slane %v1168_v22, %v548_v43  ;;  %v642_v25 = vrot.slane %v1168_v22, %v602_v5 }
 0x370   : > { %v645_v24 = vmul.f32 %v1164_v13, %v638_v23  ;;  %v646_v26 = vmul.f32 %v1166_v14, %v642_v25 }
 0x372   : > { %649 = vperm.xlu0 %1158, %v645_v24  }
 0x376   : > { %730 = vperm.xlu0 %1158, %v646_v26  }
 0x3f1   : > { %v650_v27 = vpop.permute.xlu0 %649 }
 0x3f2   : > { %v654_v28 = vrot.slane %v650_v27, %v582_v62 }
 0x3f4   : > { %811 = vst.msk [vmem:[%s270_s9] sm:$0x1] %vm810_vm6, %v654_v28  ;;  %1059 = vmatmul.mubr.msk.f32.vlgmr.msra.gmra.mrb[2].mxu0 %vm655_vm7, %v654_v28 }
 0x3f5   : > { %v731_v29 = vpop.permute.xlu0 %730 }
 0x3f6   : > { %v735_v30 = vrot.slane %v731_v29, %v582_v62 }
 0x3f8   : > { %812 = vst.msk [vmem:[%s270_s9 + $0x1] sm:$0x1] %vm810_vm6, %v735_v30  ;;  %1064 = vmatmul.mubr.msk.f32.vlgmr.msra.gmra.mrb[2].mxu1 %vm655_vm7, %v735_v30 }
 0x3f9   : > { %1182 = shalt.err (!%p1179_p3)
}
 0x3fa   : > { %s1183_s17 = scalar_lea.hbm %s1479_s14, 32  ;;  %s1187_s12 = scalar_lea.hbm %s1569_s6, 128 }
 0x3fb   : > { %p1184_p4 = scmp.ne.s32.totalorder %s1479_s14, %s1183_s17  ;;  %p1188_p9 = scmp.lt.u32.totalorder %s1479_s14, %s1569_s6 }
 0x3fc   : > { %p1189_p10 = scmp.lt.u32.totalorder %s1187_s12, %s1183_s17  ;;  %p1191_p12 = scmp.lt.u32.totalorder %s1183_s17, %s1479_s14 }
 0x3fd   : > { %p1185_p7 = pnand %p1184_p4, %p1347_p5 }
 0x3fe   : > { %p1190_p11 = por %p1189_p10, %p1188_p9 }
 0x3ff   : > { %p1186_p8 = pneg %p1185_p7 }
 0x400   : > { %p1192_p13 = por %p1191_p12, %p1190_p11 }
 0x402   : > { %p1193_p0 = pnand %p1192_p13, %p1186_p8 }
 0x404   : > { %1196 = shalt.err (!%p1193_p0)
}
 0x405   : > { %s1271_s16 = smov 16   ;;  %s1272_s20 = smov 1   ;;  %vm813_vm8 = vcmask 253952  }
 0x406   : > { %1107 = dma.vmem_to_hbm [thread:$0]  (%p1347_p5), %s1472_s10, 32, %s1479_s14, %s822_s15, %s1271_s16, %s1271_s16, %s1272_s20  }
 0x407   : > { %s263_s26 = scalar_lea.vmem [#allocation2], %s958_s29  ;;  %s1517_s12 = scalar_lea.hbm %s1568_s5, %s993_s11 }
 0x408   : > { %s835_s17 = sshll.u32 %s263_s26, 4  ;;  %s817_s10 = scalar_lea.sflag [#allocation3], %s1466_s28  ;;  %s1510_s17 = int_to_ptr.vmem [resolvable:$true] %s835_s17 }
 0x409   : > { %s1197_s29 = scalar_lea.vmem %s1510_s17, 32  ;;  %s1273_s14 = smov [#allocation2]  }
 0x40a   : > { %p1198_p1 = scmp.ne.s32.totalorder %s1510_s17, %s1197_s29  ;;  %s1201_s15 = sshll.u32 %s1273_s14, 4  ;;  %s1202_s15 = int_to_ptr.vmem [resolvable:$false] %s1201_s15 }
 0x40b   : > { %s1203_s25 = scalar_lea.vmem %s1202_s15, 64  ;;  %p1204_p4 = scmp.lt.s32.totalorder %s1510_s17, %s1202_s15 }
 0x40c   : > { %p1199_p2 = pnand %p1198_p1, %p1347_p5  ;;  %p1205_p7 = scmp.lt.s32.totalorder %s1203_s25, %s1197_s29 }
 0x40e   : > { %p1200_p3 = pneg %p1199_p2  ;;  %p1206_p8 = por %p1205_p7, %p1204_p4 }
 0x410   : > { %p1207_p9 = pnand %p1206_p8, %p1200_p3 }
 0x4c7   : > { %v724_v31 = vpop.f32.mrb[2].mxu0 }
 0x4c8   : > { %814 = vst.msk [vmem:[%s263_s26] sm:$0x1] %vm813_vm8, %v724_v31  ;;  %v1060_v32 = vpop.f32.mrb[3].mxu0 }
 0x4cb   : > { %v804_v33 = vpop.f32.mrb[2].mxu1 }
 0x4cc   : > { %815 = vst.msk [vmem:[%s263_s26 + $0x1] sm:$0x1] %vm813_vm8, %v804_v33  ;;  %v1065_v34 = vpop.f32.mrb[3].mxu1 }
 0x4cd   : > { %1210 = shalt.err (!%p1207_p9)
}
 0x4ce   : > { %s1211_s11 = scalar_lea.hbm %s1517_s12, 32  ;;  %s1215_s26 = scalar_lea.hbm %s1568_s5, 128 }
 0x4cf   : > { %p1212_p10 = scmp.ne.s32.totalorder %s1517_s12, %s1211_s11  ;;  %p1216_p13 = scmp.lt.u32.totalorder %s1517_s12, %s1568_s5 }
 0x4d0   : > { %p1217_p0 = scmp.lt.u32.totalorder %s1215_s26, %s1211_s11  ;;  %p1219_p2 = scmp.lt.u32.totalorder %s1211_s11, %s1517_s12 }
 0x4d1   : > { %p1213_p11 = pnand %p1212_p10, %p1347_p5 }
 0x4d2   : > { %p1218_p1 = por %p1217_p0, %p1216_p13 }
 0x4d3   : > { %p1214_p12 = pneg %p1213_p11 }
 0x4d4   : > { %p1220_p3 = por %p1219_p2, %p1218_p1 }
 0x4d6   : > { %p1221_p4 = pnand %p1220_p3, %p1214_p12 }
 0x4d8   : > { %1224 = shalt.err (!%p1221_p4)
}
 0x4d9   : > { %1106 = dma.vmem_to_hbm [thread:$0]  (%p1347_p5), %s1510_s17, 32, %s1517_s12, %s817_s10, %s1271_s16, %s1271_s16, %s1272_s20  }
 0x4da PF: > { %p1117_p7 = scmp.ge.s32.totalorder %s1263_s24, 2  ;;  %s866_s29 = sand.u32 1, %s1251_s21  }
 0x4db   : > { %s867_s14 = scalar_lea.sflag [#allocation3], %s866_s29 }
 0x4dc   : > { %p1111_p8 = pnand %p1117_p7, %p1351_p6 }
 0x4de   : > { %1242 = dma.done.wait (!%p1111_p8), %s867_s14, 32  }
 0x4df   : > { %1244 = vsyncadd (!%p1111_p8), %s867_s14, 4294967264  ;;  %s876_s7 = scalar_lea.sflag [#allocation5], %s866_s29 }
 0x4e0   : > { %1246 = dma.done.wait (!%p1111_p8), %s876_s7, 32  }
 0x4e1   : > { %1248 = vsyncadd (!%p1111_p8), %s876_s7, 4294967264  ;;  %p20_p5 = scmp.ge.s32.totalorder %s1334_s27, 6   ;;  %s1574_s21 = smov %s1255_s22 }
 0x4e2   : > { %s1575_s22 = smov %s1259_s23  ;;  %s1576_s23 = smov %s1345_s30 }
 0x4e3   : > { %s1577_s24 = smov %s1334_s27  ;;  %22 = sbr.rel (!%p20_p5) target bundleno = 5 (0x5), region = 95 }
 0x4ea   :  { %881 = vsyncpa [#allocation3], 1 }
 0x4eb   :  { %883 = vsyncpa [#allocation3 + $0x1], 1 }
 0x4ec   :  { %884 = vsyncpa [#allocation5], 1 }
 0x4ed   :  { %886 = vsyncpa [#allocation5 + $0x1], 1 }

</bundles_post_ra>
